<compile_context>
chip_gen: v5e
topology: v5e:2x2
jax: 0.10.0
libtpu: 0.0.40
codegen_flags: <defaults>
</compile_context>

<pallas_src>
import math
from functools import partial

import jax
import jax.numpy as jnp
import numpy as np
from jax.experimental import pallas as pl
from jax.experimental.pallas import tpu as pltpu


def _round_up(x, m):
    return (x + m - 1) // m * m


def _fc_kernel(seed_ref, x_ref, w_ref, b_ref, o_ref, *,
               use_relu, keep_threshold24, keep_scale, block_m, block_n, n_total):
    # x_ref: (block_m, K), w_ref: (block_n, K), b_ref: (1, block_n),
    # o_ref: (block_m, block_n)
    y = jax.lax.dot_general(
        x_ref[...], w_ref[...],
        dimension_numbers=(((1,), (1,)), ((), ())),   # x @ W.T, no transpose op
        preferred_element_type=jnp.float32)
    y = y + b_ref[...].astype(jnp.float32)

    if use_relu:
        y = jnp.maximum(y, 0.0)

    if keep_threshold24 is not None:
        # Counter-based hash RNG keyed on (seed, global row, global col):
        # deterministic, tiling-independent, and lowers everywhere (no
        # stateful TPU PRNG primitives).
        seed = seed_ref[0].astype(jnp.uint32)
        row0 = (pl.program_id(0) * block_m).astype(jnp.uint32)
        col0 = (pl.program_id(1) * block_n).astype(jnp.uint32)
        r = jax.lax.broadcasted_iota(jnp.int32, y.shape, 0).astype(jnp.uint32) + row0
        c = jax.lax.broadcasted_iota(jnp.int32, y.shape, 1).astype(jnp.uint32) + col0
        h = r * jnp.uint32(n_total) + c
        h = h ^ (seed * jnp.uint32(0x9E3779B9))
        # splitmix32-style finalizer
        h = (h ^ (h >> jnp.uint32(16))) * jnp.uint32(0x7FEB352D)
        h = (h ^ (h >> jnp.uint32(15))) * jnp.uint32(0x846CA68B)
        h = h ^ (h >> jnp.uint32(16))
        # Integer threshold compare on the top 24 bits (signed-safe, no
        # int->float conversion).  keep prob = 1 - dropout_r (to 2^-24).
        bits24 = (h >> jnp.uint32(8)).astype(jnp.int32)
        keep = bits24 >= jnp.int32(keep_threshold24)
        y = jnp.where(keep, y * jnp.float32(keep_scale), jnp.float32(0.0))

    o_ref[...] = y.astype(o_ref.dtype)


def fc_forward(x, weight, bias, *, use_relu=True, dropout_r=0.0,
               training=True, seed=0, block_m=256, block_n=256):
    """Pallas implementation of FC.forward.

    x:      (..., in_size)
    weight: (out_size, in_size)   (PyTorch nn.Linear convention, NOT transposed)
    bias:   (out_size,)
    """
    orig_shape = x.shape
    K = orig_shape[-1]
    M = int(np.prod(orig_shape[:-1])) if len(orig_shape) > 1 else 1
    N = weight.shape[0]

    eff_dropout = float(dropout_r) if training else 0.0

    # Tile sizes: clamp to (padded) problem size, keep (8, 128) alignment and a
    # lane-dense output (block_n multiple of 128 -> no masked vst).
    bm = min(int(block_m), _round_up(M, 8))
    bn = min(int(block_n), _round_up(N, 128))
    m_pad = _round_up(M, bm)
    n_pad = _round_up(N, bn)

    x2 = x.reshape(M, K)
    if m_pad != M:
        x2 = jnp.pad(x2, ((0, m_pad - M), (0, 0)))
    w2 = weight                                  # (N, K): stays un-transposed
    b2 = bias
    if n_pad != N:
        # TODO(synk): in a real model, pad/prepare the weight once outside the
        # hot path instead of per call.
        w2 = jnp.pad(w2, ((0, n_pad - N), (0, 0)))
        b2 = jnp.pad(b2, (0, n_pad - N))
    b2 = b2.reshape(1, n_pad)

    seed_arr = jnp.asarray([seed], dtype=jnp.int32)

    if eff_dropout > 0.0:
        keep_threshold24 = min(int(round(eff_dropout * (1 << 24))), 1 << 24)
        keep_scale = 1.0 / (1.0 - eff_dropout)
    else:
        keep_threshold24 = None
        keep_scale = 1.0

    kernel = partial(_fc_kernel, use_relu=use_relu,
                     keep_threshold24=keep_threshold24, keep_scale=keep_scale,
                     block_m=bm, block_n=bn, n_total=n_pad)

    grid = (m_pad // bm, n_pad // bn)

    itemsize = jnp.dtype(x.dtype).itemsize
    cost = pl.CostEstimate(
        flops=2 * m_pad * K * n_pad,
        transcendentals=0,
        bytes_accessed=(m_pad * K + n_pad * K + n_pad + m_pad * n_pad) * itemsize)

    # Double-buffered x / weight / bias tiles + output tile, with headroom.
    vmem_bytes = 2 * (bm * K + bn * K + bn + bm * bn) * max(itemsize, 4) + (1 << 20)
    vmem_bytes = int(min(max(vmem_bytes, 16 << 20), 64 << 20))

    out = pl.pallas_call(
        kernel,
        out_shape=jax.ShapeDtypeStruct((m_pad, n_pad), x.dtype),
        grid_spec=pltpu.PrefetchScalarGridSpec(
            num_scalar_prefetch=1,                 # seed lands in SMEM
            grid=grid,
            in_specs=[
                pl.BlockSpec((bm, K), lambda i, j, seed: (i, 0)),   # x tile
                pl.BlockSpec((bn, K), lambda i, j, seed: (j, 0)),   # weight tile (N, K)
                pl.BlockSpec((1, bn), lambda i, j, seed: (0, j)),   # bias tile
            ],
            out_specs=pl.BlockSpec((bm, bn), lambda i, j, seed: (i, j)),
        ),
        compiler_params=pltpu.CompilerParams(
            dimension_semantics=("parallel", "parallel"),
            vmem_limit_bytes=vmem_bytes),
        cost_estimate=cost,
    )(seed_arr, x2, w2, b2)

    out = out[:M, :N]
    return out.reshape(orig_shape[:-1] + (N,))


def _init_linear_params(key, in_size, out_size):
    # Deterministic init mimicking nn.Linear's kaiming-uniform defaults.
    kw, kb = jax.random.split(key)
    bound = 1.0 / math.sqrt(in_size)
    weight = jax.random.uniform(kw, (out_size, in_size), jnp.float32,
                                minval=-bound, maxval=bound)
    bias = jax.random.uniform(kb, (out_size,), jnp.float32,
                              minval=-bound, maxval=bound)
    return weight, bias


if __name__ == "__main__":
    key = jax.random.PRNGKey(0)
    kx, kp = jax.random.split(key)

    batch, seq, in_size, out_size = 2, 8, 32, 64
    x = jax.random.normal(kx, (batch, seq, in_size), jnp.float32)
    weight, bias = _init_linear_params(kp, in_size, out_size)

    # FC with defaults: use_relu=True, dropout_r=0.0
    y = fc_forward(x, weight, bias, use_relu=True, dropout_r=0.0)
    y = jax.block_until_ready(y)

    # Reference check (linear + relu).  Tolerance is loose enough to cover
    # MXU bf16-pass f32 matmul numerics on real hardware.
    y_ref = jnp.maximum(jnp.einsum("bsk,nk->bsn", x, weight) + bias, 0.0)
    np.testing.assert_allclose(np.asarray(y), np.asarray(y_ref),
                               rtol=1e-2, atol=1e-2)

    # Dropout path: nonzero entries must equal the no-dropout output scaled by
    # 1/(1-p); shape/finiteness also checked.
    p = 0.5
    y_do = fc_forward(x, weight, bias, use_relu=True, dropout_r=p,
                      training=True, seed=123)
    y_do = jax.block_until_ready(y_do)
    assert y_do.shape == (batch, seq, out_size)
    assert bool(jnp.all(jnp.isfinite(y_do)))
    y_do_np = np.asarray(y_do)
    y_np = np.asarray(y)
    nz = y_do_np != 0.0
    if nz.any():
        np.testing.assert_allclose(y_do_np[nz], y_np[nz] / (1.0 - p),
                                   rtol=1e-2, atol=1e-2)

    # Eval mode: dropout is identity.
    y_eval = fc_forward(x, weight, bias, use_relu=True, dropout_r=p,
                        training=False)
    y_eval = jax.block_until_ready(y_eval)
    np.testing.assert_allclose(np.asarray(y_eval), y_np, rtol=1e-6, atol=1e-6)

    print("KERNEL_OK")
</pallas_src>

<mosaic_0001>
module attributes {stable_mosaic.version = 11 : i64} {
  func.func @_fc_kernel(%arg0: i32, %arg1: i32, %arg2: memref<1xi32, #tpu.memory_space<smem>>, %arg3: memref<16x32xf32, #tpu.memory_space<vmem>>, %arg4: memref<128x32xf32, #tpu.memory_space<vmem>>, %arg5: memref<1x128xf32, #tpu.memory_space<vmem>>, %arg6: memref<16x128xf32, #tpu.memory_space<vmem>>) attributes {dimension_semantics = [#tpu.dimension_semantics<parallel>, #tpu.dimension_semantics<parallel>], iteration_bounds = array<i64: 1, 1>, scalar_prefetch = 1 : i64, scratch_operands = 0 : i64, tpu.core_type = #tpu.core_type<tc>, window_params = [{transform_indices = @transform_0, window_bounds = array<i64: 16, 32>}, {transform_indices = @transform_1, window_bounds = array<i64: 128, 32>}, {transform_indices = @transform_2, window_bounds = array<i64: 1, 128>}, {transform_indices = @transform_3, window_bounds = array<i64: 16, 128>}]} {
    %c0 = arith.constant 0 : index
    %c0_0 = arith.constant 0 : index
    %0 = vector.load %arg3[%c0, %c0_0] : memref<16x32xf32, #tpu.memory_space<vmem>>, vector<16x32xf32>
    %c0_1 = arith.constant 0 : index
    %c0_2 = arith.constant 0 : index
    %1 = vector.load %arg4[%c0_1, %c0_2] : memref<128x32xf32, #tpu.memory_space<vmem>>, vector<128x32xf32>
    %cst = arith.constant dense<0.000000e+00> : vector<16x128xf32>
    %2 = tpu.matmul %0, %1, %cst {dimension_numbers = #tpu.dot_dimension_numbers<[1], [1], [0], [0], [0, 0, 1, 0], [], []>} : vector<16x32xf32>, vector<128x32xf32>, vector<16x128xf32> -> vector<16x128xf32>
    %c0_3 = arith.constant 0 : index
    %c0_4 = arith.constant 0 : index
    %3 = vector.load %arg5[%c0_3, %c0_4] : memref<1x128xf32, #tpu.memory_space<vmem>>, vector<1x128xf32>
    %4 = vector.broadcast %3 : vector<1x128xf32> to vector<16x128xf32>
    %5 = arith.addf %2, %4 : vector<16x128xf32>
    %cst_5 = arith.constant 0.000000e+00 : f32
    %6 = vector.broadcast %cst_5 : f32 to vector<16x128xf32>
    %7 = arith.maximumf %5, %6 : vector<16x128xf32>
    %c0_6 = arith.constant 0 : index
    %c0_7 = arith.constant 0 : index
    %8 = vector.load %arg6[%c0_6, %c0_7] : memref<16x128xf32, #tpu.memory_space<vmem>>, vector<16x128xf32>
    tpu.vector_store %arg6[%c0_6, %c0_7], %7 {strides = array<i32>} : memref<16x128xf32, #tpu.memory_space<vmem>>, vector<16x128xf32>,
    return
  }
  func.func @transform_0(%arg0: i32, %arg1: i32, %arg2: memref<1xi32, #tpu.memory_space<smem>>) -> (i32, i32) {
    %c0_i32 = arith.constant 0 : i32
    %c0_i32_0 = arith.constant 0 : i32
    return %arg0, %c0_i32 : i32, i32
  }
  func.func @transform_1(%arg0: i32, %arg1: i32, %arg2: memref<1xi32, #tpu.memory_space<smem>>) -> (i32, i32) {
    %c0_i32 = arith.constant 0 : i32
    %c0_i32_0 = arith.constant 0 : i32
    return %arg1, %c0_i32 : i32, i32
  }
  func.func @transform_2(%arg0: i32, %arg1: i32, %arg2: memref<1xi32, #tpu.memory_space<smem>>) -> (i32, i32) {
    %c0_i32 = arith.constant 0 : i32
    %c0_i32_0 = arith.constant 0 : i32
    return %c0_i32, %arg1 : i32, i32
  }
  func.func @transform_3(%arg0: i32, %arg1: i32, %arg2: memref<1xi32, #tpu.memory_space<smem>>) -> (i32, i32) {
    %c0_i32 = arith.constant 0 : i32
    return %arg0, %arg1 : i32, i32
  }
}

</mosaic_0001>

<bundles_post_ra>
// kernel: tpu_custom_call.1
= control target key start
LH: loop header
LB: loop body
LE: loop exit
PB: predicated region body
PF: predicated region fallthrough
CT: control target
= control target key end

     0   :  { %vm39_vm0 = vcmask 261120   ;;  %s325_s0 = inlined_call_operand.<no memory space> [shape: s32[1], index: 0, kind: input, shape index: {}]   ;;  %s326_s1 = inlined_call_operand.vmem [shape: f32[16,32], index: 1, kind: input, shape index: {}]   ;;  %s327_s2 = inlined_call_operand.vmem [shape: f32[128,32], index: 2, kind: input, shape index: {}]   ;;  %s328_s3 = inlined_call_operand.vmem [shape: f32[1,128], index: 3, kind: input, shape index: {}]   ;;  %s329_s4 = inlined_call_operand.hbm [shape: f32[16,128], index: 4, kind: output, shape index: {}]  }
   0x1   :  { %v34_v0 = vld [vmem:[%s327_s2 + $0x78] sm:$0xff]  ;;  %v33_v1 = vld [vmem:[%s327_s2 + $0x70] sm:$0xff] }
   0x2   :  { %139 = vmatpush.xpose.msk.msra.mxu0 %vm39_vm0, %v34_v0  ;;  %157 = vmatpush.xpose.msk.msra.mxu1 %vm39_vm0, %v34_v0 }
   0x3   :  { %10 = vsyncpa [#allocation5], 0  ;;  %v32_v2 = vld [vmem:[%s327_s2 + $0x68] sm:$0xff]  ;;  %v31_v3 = vld [vmem:[%s327_s2 + $0x60] sm:$0xff]  ;;  %s127_s28 = sshll.u32 %s329_s4, 4  ;;  %s205_s29 = smov 8   ;;  %s128_s28 = int_to_ptr.hbm [resolvable:$true] %s127_s28 }
   0x4   :  { %v30_v4 = vld [vmem:[%s327_s2 + $0x58] sm:$0xff]  ;;  %v29_v5 = vld [vmem:[%s327_s2 + $0x50] sm:$0xff]  ;;  %v28_v6 = vld [vmem:[%s327_s2 + $0x48] sm:$0xff] }
   0x5   :  { %v27_v7 = vld [vmem:[%s327_s2 + $0x40] sm:$0xff]  ;;  %v26_v8 = vld [vmem:[%s327_s2 + $0x38] sm:$0xff]  ;;  %v25_v9 = vld [vmem:[%s327_s2 + $0x30] sm:$0xff] }
   0x6   :  { %140 = vmatpush.xpose.msk.msra.mxu0 %vm39_vm0, %v33_v1  ;;  %158 = vmatpush.xpose.msk.msra.mxu1 %vm39_vm0, %v33_v1  ;;  %v24_v10 = vld [vmem:[%s327_s2 + $0x28] sm:$0xff]  ;;  %v23_v11 = vld [vmem:[%s327_s2 + $0x20] sm:$0xff]  ;;  %v22_v12 = vld [vmem:[%s327_s2 + $0x18] sm:$0xff] }
   0x7   :  { %v21_v13 = vld [vmem:[%s327_s2 + $0x10] sm:$0xff]  ;;  %v20_v14 = vld [vmem:[%s327_s2 + $0x8] sm:$0xff]  ;;  %v19_v15 = vld [vmem:[%s327_s2] sm:$0xff]  ;;  %s203_s2 = smov [#allocation4]  }
   0x8   :  { %v17_v16 = vld [vmem:[%s326_s1] sm:$0xff]  ;;  %v18_v17 = vld [vmem:[%s326_s1 + $0x8] sm:$0xff]  ;;  %s125_s25 = sshll.u32 %s203_s2, 4  ;;  %s204_s1 = smov 128   ;;  %s126_s25 = int_to_ptr.vmem [resolvable:$true] %s125_s25 }
   0x9   :  { %v176_v18 = vld [vmem:[%s328_s3] ss:$0 sm:$0xff] }
   0xa   :  { %141 = vmatpush.xpose.msk.msra.mxu0 %vm39_vm0, %v32_v2  ;;  %159 = vmatpush.xpose.msk.msra.mxu1 %vm39_vm0, %v32_v2 }
   0xe   :  { %142 = vmatpush.xpose.msk.msra.mxu0 %vm39_vm0, %v31_v3  ;;  %160 = vmatpush.xpose.msk.msra.mxu1 %vm39_vm0, %v31_v3 }
  0x12   :  { %143 = vmatpush.xpose.msk.msra.mxu0 %vm39_vm0, %v30_v4  ;;  %161 = vmatpush.xpose.msk.msra.mxu1 %vm39_vm0, %v30_v4 }
  0x16   :  { %144 = vmatpush.xpose.msk.msra.mxu0 %vm39_vm0, %v29_v5  ;;  %162 = vmatpush.xpose.msk.msra.mxu1 %vm39_vm0, %v29_v5 }
  0x1a   :  { %145 = vmatpush.xpose.msk.msra.mxu0 %vm39_vm0, %v28_v6  ;;  %163 = vmatpush.xpose.msk.msra.mxu1 %vm39_vm0, %v28_v6 }
  0x1e   :  { %146 = vmatpush.xpose.msk.msra.mxu0 %vm39_vm0, %v27_v7  ;;  %164 = vmatpush.xpose.msk.msra.mxu1 %vm39_vm0, %v27_v7 }
  0x22   :  { %147 = vmatpush.xpose.msk.msra.mxu0 %vm39_vm0, %v26_v8  ;;  %165 = vmatpush.xpose.msk.msra.mxu1 %vm39_vm0, %v26_v8 }
  0x26   :  { %148 = vmatpush.xpose.msk.msra.mxu0 %vm39_vm0, %v25_v9  ;;  %166 = vmatpush.xpose.msk.msra.mxu1 %vm39_vm0, %v25_v9 }
  0x2a   :  { %149 = vmatpush.xpose.msk.msra.mxu0 %vm39_vm0, %v24_v10  ;;  %167 = vmatpush.xpose.msk.msra.mxu1 %vm39_vm0, %v24_v10 }
  0x2e   :  { %150 = vmatpush.xpose.msk.msra.mxu0 %vm39_vm0, %v23_v11  ;;  %168 = vmatpush.xpose.msk.msra.mxu1 %vm39_vm0, %v23_v11 }
  0x32   :  { %151 = vmatpush.xpose.msk.msra.mxu0 %vm39_vm0, %v22_v12  ;;  %169 = vmatpush.xpose.msk.msra.mxu1 %vm39_vm0, %v22_v12 }
  0x36   :  { %152 = vmatpush.xpose.msk.msra.mxu0 %vm39_vm0, %v21_v13  ;;  %170 = vmatpush.xpose.msk.msra.mxu1 %vm39_vm0, %v21_v13 }
  0x3a   :  { %153 = vmatpush.xpose.msk.msra.mxu0 %vm39_vm0, %v20_v14  ;;  %171 = vmatpush.xpose.msk.msra.mxu1 %vm39_vm0, %v20_v14 }
  0x3e   :  { %154 = vmatpush.xpose.msk.msra.mxu0 %vm39_vm0, %v19_v15  ;;  %172 = vmatpush.xpose.msk.msra.mxu1 %vm39_vm0, %v19_v15 }
  0x41   :  { %155 = vmatmul.msk.f32.vlgmr.msra.gmra.mxu0 %vm39_vm0, %v17_v16  ;;  %156 = vmatmul.msk.f32.vlgmr.msra.gmra.mxu1 %vm39_vm0, %v18_v17 }
  0xbe   :  { %v111_v19 = vpop.f32.mrf.mxu0  ;;  %v114_v20 = vpop.f32.mrf.mxu1 }
  0xbf   :  { %v112_v21 = vadd.f32 %v176_v18, %v111_v19  ;;  %v115_v22 = vadd.f32 %v176_v18, %v114_v20 }
  0xc1   :  { %v117_v23 = vmax.f32 %v112_v21, 0.0  ;;  %v118_v24 = vmax.f32 %v115_v22, 0.0 }
  0xc3   :  { %119 = vst [vmem:[#allocation4] sm:$0xff] %v117_v23 }
  0xc4   :  { %120 = vst [vmem:[#allocation4 + $0x8] sm:$0xff] %v118_v24 }
  0xc5   :  { %133 = dma.vmem_to_hbm [thread:$0]  %s126_s25, 256, %s128_s28, [#allocation5], %s204_s1, %s204_s1, %s205_s29  }
  0xc6   :  { %201 = dma.done.wait [#allocation5], 256  }
  0xc7   :  { %202 = vsyncadd [#allocation5], 4294967040 }
  0xc8   :  { %138 = vsyncpa [#allocation5], 1 }

</bundles_post_ra>
